<compile_context>
chip_gen: v7x
topology: tpu7x:2x2x1
jax: 0.10.0
libtpu: 0.0.40
codegen_flags: <defaults>
</compile_context>

<pallas_src>
import math

import jax
import jax.numpy as jnp
from jax.experimental import pallas as pl
from jax.experimental.pallas import tpu as pltpu

_NSEM = 8                    # max DMAs in flight per grid step
_MIN_CHUNK_BYTES = 2 << 20   # don't split a program's region below ~2 MiB/DMA


def flatten(x: jax.Array) -> jax.Array:
    """Pallas equivalent of torch x.view(batch_size, -1)."""
    batch = x.shape[0]
    flat = int(math.prod(x.shape[1:]))
    total = batch * flat
    itemsize = jnp.dtype(x.dtype).itemsize

    if total == 0:
        # Degenerate shape: the (free) reshape is the whole op.
        return jnp.reshape(x, (batch, flat))

    # Batch-independent contiguous slab (metadata-only reshape in XLA).
    lanes = 128 if total % 128 == 0 else 1
    rows = total // lanes
    x_slab = jnp.reshape(x, (rows, lanes))

    # v7x megacore: shard the copy over 2 TensorCores when the slab splits
    # evenly; harmless sequential 2-step loop on v5e / v6e.
    n_progs = 2 if (rows % 2 == 0 and rows >= 2) else 1
    rows_per_prog = rows // n_progs

    # Up to _NSEM chunked DMAs per program, each at least ~_MIN_CHUNK_BYTES
    # (small tensors collapse to a single DMA per program).
    prog_bytes = rows_per_prog * lanes * itemsize
    n_chunks = max(1, min(_NSEM, rows_per_prog,
                          -(-prog_bytes // _MIN_CHUNK_BYTES)))
    base = rows_per_prog // n_chunks
    rem = rows_per_prog % n_chunks
    chunk_rows = [base + 1] * rem + [base] * (n_chunks - rem)  # static sizes

    def kernel(x_hbm, o_hbm, sems):
        # Each program copies its disjoint row range [row0, row0+rows_per_prog)
        # as a handful of contiguous HBM->HBM DMAs kept in flight together.
        row0 = pl.program_id(0) * rows_per_prog
        copies = []
        off = 0
        for i, r in enumerate(chunk_rows):     # static unrolled loop
            cp = pltpu.make_async_copy(
                x_hbm.at[pl.ds(row0 + off, r)],
                o_hbm.at[pl.ds(row0 + off, r)],
                sems.at[i],
            )
            cp.start()
            copies.append(cp)
            off += r
        for cp in copies:
            cp.wait()

    out_slab = pl.pallas_call(
        kernel,
        out_shape=jax.ShapeDtypeStruct((rows, lanes), x.dtype),
        grid=(n_progs,),
        in_specs=[pl.BlockSpec(memory_space=pl.ANY)],
        out_specs=pl.BlockSpec(memory_space=pl.ANY),
        scratch_shapes=[pltpu.SemaphoreType.DMA((_NSEM,))],
        compiler_params=pltpu.CompilerParams(
            dimension_semantics=("parallel",),
        ),
        cost_estimate=pl.CostEstimate(
            flops=0,
            transcendentals=0,
            bytes_accessed=2 * total * itemsize,
        ),
    )(x_slab)

    # TODO(synk): a pure flatten is view-only in torch; in production simply
    # return jnp.reshape(x, (batch, flat)) and skip the copy entirely.
    return jnp.reshape(out_slab, (batch, flat))


if __name__ == "__main__":
    key = jax.random.PRNGKey(0)
    # Small NCHW input: batch=2, channels=4, spatial=16x16 -> flat = 1024.
    x = jax.random.normal(key, (2, 4, 16, 16), dtype=jnp.float32)

    out = flatten(x)
    out = jax.block_until_ready(out)

    # Reference: same semantics as torch .view(batch, -1) on contiguous NCHW.
    ref = x.reshape(x.shape[0], -1)
    assert out.shape == (2, 4 * 16 * 16), out.shape
    assert out.dtype == x.dtype
    assert jnp.array_equal(out, ref)

    print("KERNEL_OK")
</pallas_src>

<mosaic_0001>
module attributes {stable_mosaic.version = 11 : i64} {
  func.func @kernel(%arg0: i32, %arg1: memref<16x128xf32, #tpu.memory_space<any>>, %arg2: memref<16x128xf32, #tpu.memory_space<any>>, %arg3: memref<8x!tpu.dma_semaphore, #tpu.memory_space<semaphore_mem>>) attributes {dimension_semantics = [#tpu.dimension_semantics<parallel>], iteration_bounds = array<i64: 2>, scalar_prefetch = 0 : i64, scratch_operands = 1 : i64, tpu.core_type = #tpu.core_type<tc>, window_params = [{}, {}]} {
    %c8_i32 = arith.constant 8 : i32
    %0 = arith.muli %arg0, %c8_i32 : i32
    %c0_i32 = arith.constant 0 : i32
    %1 = arith.addi %0, %c0_i32 : i32
    %c0_i32_0 = arith.constant 0 : i32
    %2 = arith.addi %0, %c0_i32_0 : i32
    %c0_i32_1 = arith.constant 0 : i32
    %c0_i32_2 = arith.constant 0 : i32
    %3 = tpu.memref_slice %arg1[%1, %c0_i32_2] : memref<16x128xf32, #tpu.memory_space<any>> -> memref<8x128xf32, #tpu.memory_space<any>>
    %c0_i32_3 = arith.constant 0 : i32
    %4 = tpu.memref_slice %arg2[%2, %c0_i32_3] : memref<16x128xf32, #tpu.memory_space<any>> -> memref<8x128xf32, #tpu.memory_space<any>>
    %5 = tpu.memref_slice %arg3[%c0_i32_1] : memref<8x!tpu.dma_semaphore, #tpu.memory_space<semaphore_mem>> -> memref<1x!tpu.dma_semaphore, #tpu.memory_space<semaphore_mem>>
    %6 = tpu.memref_squeeze %5 : memref<1x!tpu.dma_semaphore, #tpu.memory_space<semaphore_mem>> -> memref<!tpu.dma_semaphore, #tpu.memory_space<semaphore_mem>>
    tpu.enqueue_dma source(%3 : memref<8x128xf32, #tpu.memory_space<any>>) target(%4 : memref<8x128xf32, #tpu.memory_space<any>>) target_semaphore(%6 : memref<!tpu.dma_semaphore, #tpu.memory_space<semaphore_mem>>)
    %c0_i32_4 = arith.constant 0 : i32
    %c0_i32_5 = arith.constant 0 : i32
    %7 = tpu.memref_slice %arg1[%1, %c0_i32_5] : memref<16x128xf32, #tpu.memory_space<any>> -> memref<8x128xf32, #tpu.memory_space<any>>
    %c0_i32_6 = arith.constant 0 : i32
    %8 = tpu.memref_slice %arg2[%2, %c0_i32_6] : memref<16x128xf32, #tpu.memory_space<any>> -> memref<8x128xf32, #tpu.memory_space<any>>
    %9 = tpu.memref_slice %arg3[%c0_i32_4] : memref<8x!tpu.dma_semaphore, #tpu.memory_space<semaphore_mem>> -> memref<1x!tpu.dma_semaphore, #tpu.memory_space<semaphore_mem>>
    %10 = tpu.memref_squeeze %9 : memref<1x!tpu.dma_semaphore, #tpu.memory_space<semaphore_mem>> -> memref<!tpu.dma_semaphore, #tpu.memory_space<semaphore_mem>>
    tpu.wait_dma2 semaphore(%10 : memref<!tpu.dma_semaphore, #tpu.memory_space<semaphore_mem>>) src(%7 : memref<8x128xf32, #tpu.memory_space<any>>) dst(%8 : memref<8x128xf32, #tpu.memory_space<any>>)
    return
  }
}

</mosaic_0001>

<bundles_post_ra>
// kernel: tpu_custom_call.1
= control target key start
LH: loop header
LB: loop body
LE: loop exit
PB: predicated region body
PF: predicated region fallthrough
CT: control target
= control target key end

     0   :  { %s128_s6 = smov 0   ;;  %s151_s0 = inlined_call_operand.hbm [shape: f32[16,128], index: 0, kind: input, shape index: {}]   ;;  %s152_s1 = inlined_call_operand.hbm [shape: f32[16,128], index: 1, kind: output, shape index: {}]  }
   0x1 LB: > { %s109_s7 = sshll.u32 %s130_s6, 7  ;;  %s132_s14 = smov [#allocation2]   ;;  %s130_s6 = sphi %s128_s6, %s11_s6  }
   0x2   : > { %s15_s10 = scalar_lea.hbm %s151_s0, %s109_s7  ;;  %s17_s13 = scalar_lea.hbm %s152_s1, %s109_s7 }
   0x3   : > { %s133_s15 = smov [#allocation3]   ;;  %s134_s16 = smov 0  }
   0x4   : > { %30 = dma.general %s15_s10, 128, %s17_s13, %s132_s14, %s133_s15, [#allocation4], %s134_s16, 0  }
   0x5   : > { %126 = dma.done.wait [#allocation2], 128 }
   0x6   : > { %127 = vsyncadd [#allocation2], 4294967168  ;;  %s11_s6 = sadd.s32 1, %s130_s6  }
   0x7   : > { %p8_p0 = scmp.ge.s32.totalorder %s11_s6, 2  }
   0x9   :  { %10 = sbr.rel (!%p8_p0) target bundleno = 1 (0x1), region = 28 }
  0x10   :  { %34 = vsyncmov [#allocation2] }
  0x13   :  { %s35_s17 = vpop.sfrf %34 }
  0x14   :  { %p101_p1 = scmp.ne.s32.totalorder %s35_s17, 0 }
  0x16   :  { %39 = shalt.err (%p101_p1)  }
  0x17   :  { %41 = vsyncmov [#allocation2 + $0x1] }
  0x1a   :  { %s42_s18 = vpop.sfrf %41 }
  0x1b   :  { %p102_p2 = scmp.ne.s32.totalorder %s42_s18, 0 }
  0x1d   :  { %46 = shalt.err (%p102_p2)  }
  0x1e   :  { %48 = vsyncmov [#allocation2 + $0x2] }
  0x21   :  { %s49_s19 = vpop.sfrf %48 }
  0x22   :  { %p103_p3 = scmp.ne.s32.totalorder %s49_s19, 0 }
  0x24   :  { %53 = shalt.err (%p103_p3)  }
  0x25   :  { %55 = vsyncmov [#allocation2 + $0x3] }
  0x28   :  { %s56_s20 = vpop.sfrf %55 }
  0x29   :  { %p104_p4 = scmp.ne.s32.totalorder %s56_s20, 0 }
  0x2b   :  { %60 = shalt.err (%p104_p4)  }
  0x2c   :  { %62 = vsyncmov [#allocation2 + $0x4] }
  0x2f   :  { %s63_s21 = vpop.sfrf %62 }
  0x30   :  { %p105_p5 = scmp.ne.s32.totalorder %s63_s21, 0 }
  0x32   :  { %67 = shalt.err (%p105_p5)  }
  0x33   :  { %69 = vsyncmov [#allocation2 + $0x5] }
  0x36   :  { %s70_s0 = vpop.sfrf %69 }
  0x37   :  { %p106_p6 = scmp.ne.s32.totalorder %s70_s0, 0 }
  0x39   :  { %74 = shalt.err (%p106_p6)  }
  0x3a   :  { %76 = vsyncmov [#allocation2 + $0x6] }
  0x3d   :  { %s77_s1 = vpop.sfrf %76 }
  0x3e   :  { %p107_p7 = scmp.ne.s32.totalorder %s77_s1, 0 }
  0x40   :  { %81 = shalt.err (%p107_p7)  }
  0x41   :  { %83 = vsyncmov [#allocation2 + $0x7] }
  0x44   :  { %s84_s22 = vpop.sfrf %83 }
  0x45   :  { %p108_p8 = scmp.ne.s32.totalorder %s84_s22, 0 }
  0x47   :  { %88 = shalt.err (%p108_p8)  }

</bundles_post_ra>
